<compile_context>
chip_gen: v5e
topology: v5e:2x2
jax: 0.10.0
libtpu: 0.0.40
codegen_flags: <defaults>
</compile_context>

<pallas_src>
import math

import jax
import jax.numpy as jnp
from jax.experimental import pallas as pl
from jax.experimental.pallas import tpu as pltpu


_LANE = 128      # lane width (last dim)
_SUBLANE = 8     # f32 sublane width (second-to-last dim)


def _cdiv(a, b):
    return -(-a // b)


def _vmem_capacity_bytes():
    """Physical VMEM of the attached chip; conservative fallback (v7x = 64 MiB)."""
    try:
        info = pltpu.get_tpu_info()
        cap = getattr(info, "vmem_capacity_bytes", None)
        if cap:
            return int(cap)
    except Exception:
        pass
    return 64 << 20


# -----------------------------------------------------------------------------
# Kernels
# -----------------------------------------------------------------------------

def _ensemble_fc_small_kernel(x_ref, w_ref, b_ref, o_ref):
    """Grid-less kernel: all E members resident in VMEM, batched matmul."""
    acc = jnp.einsum("ebi,eio->ebo", x_ref[...], w_ref[...],
                     preferred_element_type=jnp.float32)        # (E, B, Out) f32
    o_ref[...] = (acc + b_ref[...].astype(jnp.float32)).astype(o_ref.dtype)


def _ensemble_fc_tiled_kernel(x_ref, w_ref, b_ref, o_ref):
    """One (TB, In) @ (In, TO) tile per grid step (ensemble dim squeezed)."""
    acc = jnp.dot(x_ref[...], w_ref[...],
                  preferred_element_type=jnp.float32)           # (TB, TO) f32
    o_ref[...] = (acc + b_ref[...].astype(jnp.float32)).astype(o_ref.dtype)


# -----------------------------------------------------------------------------
# Wrapper
# -----------------------------------------------------------------------------

def ensemble_fc(x, weight, bias, *, batch_tile=1024, out_tile=512,
                compute_dtype=jnp.bfloat16, small_vmem_bytes=2 << 20):
    """out = bmm(x, weight) + bias[:, None, :].

    x: (E, B, In), weight: (E, In, Out), bias: (E, Out) -> (E, B, Out).

    compute_dtype: matmul-operand dtype.  x / weight are cast at the kernel
      boundary iff compute_dtype is strictly narrower than their dtype.
      Accumulation is always f32 on the MXU; bias and the output stay in
      x.dtype.  Pass compute_dtype=None for the exact-f32 path.
    """
    E, B, In = x.shape
    Out = weight.shape[2]
    assert weight.shape == (E, In, Out)
    assert bias.shape == (E, Out)

    out_dtype = x.dtype

    # --- optional bf16 cast of the matmul operands (perf-review item #1) ---
    x_c, w_c = x, weight
    if (compute_dtype is not None
            and jnp.issubdtype(x.dtype, jnp.floating)
            and jnp.dtype(compute_dtype).itemsize < jnp.dtype(x.dtype).itemsize):
        x_c = x.astype(compute_dtype)
        w_c = weight.astype(compute_dtype)

    isz_c = jnp.dtype(x_c.dtype).itemsize
    isz_b = jnp.dtype(bias.dtype).itemsize
    isz_o = jnp.dtype(out_dtype).itemsize

    # Bias as (E, 1, Out): free reshape, gives a legal (1, TO) bias block.
    b3 = bias.reshape(E, 1, Out)

    flops = 2 * E * B * In * Out

    # ----------------------------- tiny path --------------------------------
    # Everything resident in VMEM, one grid-less call, no pads / slices.
    total_bytes = (E * B * In + E * In * Out) * isz_c \
        + E * Out * isz_b + E * B * Out * isz_o
    if total_bytes <= small_vmem_bytes:
        cost = pl.CostEstimate(flops=flops, transcendentals=0,
                               bytes_accessed=int(total_bytes))
        return pl.pallas_call(
            _ensemble_fc_small_kernel,
            out_shape=jax.ShapeDtypeStruct((E, B, Out), out_dtype),
            cost_estimate=cost,
        )(x_c, w_c, b3)

    # ----------------------------- tiled path --------------------------------
    vmem_cap = _vmem_capacity_bytes()
    # Double-buffered working-set budget derived from the chip:
    # ~25 MiB on v7x (64 MiB VMEM), ~51 MiB on v5e/v6e (128 MiB VMEM).
    budget = max(8 << 20, min(int(0.4 * vmem_cap), 96 << 20))

    # Out tile: lane multiple (or the full Out when it fits), capped so the
    # weight tile's double buffer stays under ~half the budget.
    to_cap = budget // max(4 * In * isz_c, 1)
    TO_cap = max(_LANE, (min(out_tile, to_cap) // _LANE) * _LANE)
    if Out <= TO_cap:
        TO, n_out = Out, 1
    else:
        TO, n_out = TO_cap, _cdiv(Out, TO_cap)

    # Batch tile: sublane multiple (or the full B), sized so the whole
    # double-buffered working set fits the budget.
    fixed = In * TO * isz_c + TO * isz_b
    tb_budget = (budget // 2 - fixed) // max(In * isz_c + TO * isz_o, 1)
    TB_cap = max(_SUBLANE,
                 (min(batch_tile, max(tb_budget, _SUBLANE)) // _SUBLANE) * _SUBLANE)
    if B <= TB_cap:
        TB, n_b = B, 1
    else:
        TB, n_b = TB_cap, _cdiv(B, TB_cap)
    # TODO(synk): for very large In (>~4K) add an "arbitrary" K grid axis with
    # an f32 VMEM accumulator so tiles keep fitting v7x's 64 MiB VMEM.

    # Grid order: keep the larger per-ensemble operand (x slab vs weight slab)
    # resident across the innermost axis so it is read from HBM only once; the
    # smaller operand streams double-buffered.
    x_resident = B * In >= In * Out          # i.e. B >= Out
    sq = pl.Squeezed()
    if x_resident:
        grid = (E, n_b, n_out)
        in_specs = [
            pl.BlockSpec((sq, TB, In), lambda e, b, o: (e, b, 0)),   # resident
            pl.BlockSpec((sq, In, TO), lambda e, b, o: (e, 0, o)),   # streams
            pl.BlockSpec((sq, 1, TO), lambda e, b, o: (e, 0, o)),
        ]
        out_spec = pl.BlockSpec((sq, TB, TO), lambda e, b, o: (e, b, o))
        bytes_accessed = E * (B * In * isz_c + n_b * In * Out * isz_c
                              + n_b * Out * isz_b + B * Out * isz_o)
    else:
        grid = (E, n_out, n_b)
        in_specs = [
            pl.BlockSpec((sq, TB, In), lambda e, o, b: (e, b, 0)),   # streams
            pl.BlockSpec((sq, In, TO), lambda e, o, b: (e, 0, o)),   # resident
            pl.BlockSpec((sq, 1, TO), lambda e, o, b: (e, 0, o)),
        ]
        out_spec = pl.BlockSpec((sq, TB, TO), lambda e, o, b: (e, b, o))
        bytes_accessed = E * (n_out * B * In * isz_c + In * Out * isz_c
                              + Out * isz_b + B * Out * isz_o)

    est_bytes = 2 * (TB * In * isz_c + In * TO * isz_c
                     + TO * isz_b + TB * TO * isz_o)
    # Always pass a VMEM limit (v5e's scoped default is only 16 MiB), capped
    # below the chip's physical VMEM so it is valid on v7x as well.
    vmem_limit = int(min(max(est_bytes + (8 << 20), 32 << 20),
                         int(0.9 * vmem_cap)))

    cost = pl.CostEstimate(flops=flops, transcendentals=0,
                           bytes_accessed=int(bytes_accessed))

    return pl.pallas_call(
        _ensemble_fc_tiled_kernel,
        out_shape=jax.ShapeDtypeStruct((E, B, Out), out_dtype),
        grid_spec=pltpu.PrefetchScalarGridSpec(
            num_scalar_prefetch=0,
            grid=grid,
            in_specs=in_specs,
            out_specs=out_spec,
        ),
        compiler_params=pltpu.CompilerParams(
            dimension_semantics=("parallel", "parallel", "parallel"),
            vmem_limit_bytes=vmem_limit),
        cost_estimate=cost,
    )(x_c, w_c, b3)


# -----------------------------------------------------------------------------
# Parameter init mirroring the PyTorch __init__
# -----------------------------------------------------------------------------

def init_params(key, ensemble_size, in_features, out_features, dtype=jnp.float32):
    """weight: xavier_uniform_ over (E, In, Out); bias: zeros."""
    rf = out_features
    fan_in = in_features * rf
    fan_out = ensemble_size * rf
    bound = math.sqrt(6.0 / (fan_in + fan_out))
    weight = jax.random.uniform(
        key, (ensemble_size, in_features, out_features),
        minval=-bound, maxval=bound, dtype=dtype)
    bias = jnp.zeros((ensemble_size, out_features), dtype=dtype)
    return weight, bias


if __name__ == "__main__":
    key = jax.random.PRNGKey(0)
    ks = jax.random.split(key, 8)

    # --- Case 1: tiny MBPO-sized layer -> grid-less resident path, exact f32.
    E1, B1, In1, Out1 = 4, 8, 32, 16
    w1, b1 = init_params(ks[0], E1, In1, Out1)
    b1 = b1 + 0.1 * jax.random.normal(ks[1], b1.shape, dtype=jnp.float32)
    x1 = jax.random.normal(ks[2], (E1, B1, In1), dtype=jnp.float32)
    out1 = jax.block_until_ready(ensemble_fc(x1, w1, b1, compute_dtype=None))
    ref1 = jnp.einsum("ebi,eio->ebo", x1, w1,
                      precision=jax.lax.Precision.HIGHEST) + b1[:, None, :]
    assert out1.shape == (E1, B1, Out1) and out1.dtype == x1.dtype
    assert jnp.allclose(out1, ref1, atol=1e-4, rtol=1e-4)

    # --- Case 2: tiled path, default bf16 compute, partial B and Out tiles,
    #     x-resident grid order (B >> Out).
    E2, B2, In2, Out2 = 3, 1000, 256, 200
    w2, b2 = init_params(ks[3], E2, In2, Out2)
    b2 = b2 + 0.1 * jax.random.normal(ks[4], b2.shape, dtype=jnp.float32)
    x2 = jax.random.normal(ks[5], (E2, B2, In2), dtype=jnp.float32)
    out2 = jax.block_until_ready(
        ensemble_fc(x2, w2, b2, batch_tile=256, out_tile=128,
                    small_vmem_bytes=0))
    ref2_bf16 = jnp.einsum(
        "ebi,eio->ebo",
        x2.astype(jnp.bfloat16).astype(jnp.float32),
        w2.astype(jnp.bfloat16).astype(jnp.float32),
        precision=jax.lax.Precision.HIGHEST) + b2[:, None, :]
    ref2_f32 = jnp.einsum("ebi,eio->ebo", x2, w2,
                          precision=jax.lax.Precision.HIGHEST) + b2[:, None, :]
    assert out2.shape == (E2, B2, Out2) and out2.dtype == x2.dtype
    assert jnp.allclose(out2, ref2_bf16, atol=2e-3, rtol=2e-3)
    assert jnp.allclose(out2, ref2_f32, atol=2e-2, rtol=2e-2)   # bf16 operands

    # --- Case 3: same problem, exact-f32 tiled path.
    out3 = jax.block_until_ready(
        ensemble_fc(x2, w2, b2, batch_tile=256, out_tile=128,
                    compute_dtype=None, small_vmem_bytes=0))
    assert jnp.allclose(out3, ref2_f32, atol=2e-4, rtol=2e-4)

    # --- Case 4: weight-resident grid order (Out >> B), multiple Out tiles.
    E4, B4, In4, Out4 = 3, 64, 256, 1024
    w4, b4 = init_params(ks[6], E4, In4, Out4)
    b4 = b4 + 0.1 * jax.random.normal(ks[7], b4.shape, dtype=jnp.float32)
    x4 = jax.random.normal(ks[0], (E4, B4, In4), dtype=jnp.float32)
    out4 = jax.block_until_ready(
        ensemble_fc(x4, w4, b4, out_tile=256, compute_dtype=None,
                    small_vmem_bytes=0))
    ref4 = jnp.einsum("ebi,eio->ebo", x4, w4,
                      precision=jax.lax.Precision.HIGHEST) + b4[:, None, :]
    assert out4.shape == (E4, B4, Out4)
    assert jnp.allclose(out4, ref4, atol=2e-4, rtol=2e-4)

    print("KERNEL_OK")
</pallas_src>

<mosaic_0001>
module attributes {stable_mosaic.version = 11 : i64} {
  func.func @_ensemble_fc_small_kernel(%arg0: memref<4x8x32xf32, #tpu.memory_space<vmem>>, %arg1: memref<4x32x16xf32, #tpu.memory_space<vmem>>, %arg2: memref<4x1x16xf32, #tpu.memory_space<vmem>>, %arg3: memref<4x8x16xf32, #tpu.memory_space<vmem>>) attributes {dimension_semantics = [], scalar_prefetch = 0 : i64, scratch_operands = 0 : i64, tpu.core_type = #tpu.core_type<tc>} {
    %c0 = arith.constant 0 : index
    %c0_0 = arith.constant 0 : index
    %c0_1 = arith.constant 0 : index
    %0 = vector.load %arg0[%c0, %c0_0, %c0_1] : memref<4x8x32xf32, #tpu.memory_space<vmem>>, vector<4x8x32xf32>
    %c0_2 = arith.constant 0 : index
    %c0_3 = arith.constant 0 : index
    %c0_4 = arith.constant 0 : index
    %1 = vector.load %arg1[%c0_2, %c0_3, %c0_4] : memref<4x32x16xf32, #tpu.memory_space<vmem>>, vector<4x32x16xf32>
    "tpu.trace_start"() <{level = 10 : i32, message = "ebi,eio->ebo"}> : () -> ()
    %cst = arith.constant dense<0.000000e+00> : vector<4x8x16xf32>
    %2 = tpu.matmul %0, %1, %cst {dimension_numbers = #tpu.dot_dimension_numbers<[2], [1], [1], [2], [0, 0, 0, 1, 1, 2], [0], [0]>} : vector<4x8x32xf32>, vector<4x32x16xf32>, vector<4x8x16xf32> -> vector<4x8x16xf32>
    "tpu.trace_stop"() : () -> ()
    %c0_5 = arith.constant 0 : index
    %c0_6 = arith.constant 0 : index
    %c0_7 = arith.constant 0 : index
    %3 = vector.load %arg2[%c0_5, %c0_6, %c0_7] : memref<4x1x16xf32, #tpu.memory_space<vmem>>, vector<4x1x16xf32>
    %4 = vector.broadcast %3 : vector<4x1x16xf32> to vector<4x8x16xf32>
    %5 = arith.addf %2, %4 : vector<4x8x16xf32>
    %c0_8 = arith.constant 0 : index
    %c0_9 = arith.constant 0 : index
    %c0_10 = arith.constant 0 : index
    %6 = vector.load %arg3[%c0_8, %c0_9, %c0_10] : memref<4x8x16xf32, #tpu.memory_space<vmem>>, vector<4x8x16xf32>
    tpu.vector_store %arg3[%c0_8, %c0_9, %c0_10], %5 {strides = array<i32>} : memref<4x8x16xf32, #tpu.memory_space<vmem>>, vector<4x8x16xf32>,
    return
  }
}

</mosaic_0001>

<bundles_post_ra>
// kernel: tpu_custom_call.1
= control target key start
LH: loop header
LB: loop body
LE: loop exit
PB: predicated region body
PF: predicated region fallthrough
CT: control target
= control target key end

     0   :  { %vm51_vm0 = vcmask 261120   ;;  %s310_s0 = inlined_call_operand.vmem [shape: f32[4,8,32], index: 0, kind: input, shape index: {}]   ;;  %s311_s1 = inlined_call_operand.vmem [shape: f32[4,32,16], index: 1, kind: input, shape index: {}]   ;;  %s312_s2 = inlined_call_operand.vmem [shape: f32[4,1,16], index: 2, kind: input, shape index: {}]   ;;  %s313_s3 = inlined_call_operand.hbm [shape: f32[4,8,16], index: 3, kind: output, shape index: {}]  }
   0x1   :  { %v30_v0 = vld [vmem:[%s311_s1 + $0x58] sm:$0xff]  ;;  %v29_v2 = vld [vmem:[%s311_s1 + $0x50] sm:$0xff]  ;;  %v28_v4 = vld [vmem:[%s311_s1 + $0x48] sm:$0xff] }
   0x2   :  { %v34_v1 = vld [vmem:[%s311_s1 + $0x78] sm:$0xff]  ;;  %113 = vmatpush.msra.mxu2 %v30_v0  ;;  %v33_v3 = vld [vmem:[%s311_s1 + $0x70] sm:$0xff]  ;;  %v32_v5 = vld [vmem:[%s311_s1 + $0x68] sm:$0xff] }
   0x3   :  { %136 = vmatpush.msra.mxu3 %v34_v1  ;;  %v22_v6 = vld [vmem:[%s311_s1 + $0x18] sm:$0xff]  ;;  %v27_v8 = vld [vmem:[%s311_s1 + $0x40] sm:$0xff]  ;;  %v21_v10 = vld [vmem:[%s311_s1 + $0x10] sm:$0xff] }
   0x4   :  { %v26_v7 = vld [vmem:[%s311_s1 + $0x38] sm:$0xff]  ;;  %114 = vmatpush.msra.mxu2 %v29_v2  ;;  %67 = vmatpush.msra.mxu0 %v22_v6  ;;  %v31_v9 = vld [vmem:[%s311_s1 + $0x60] sm:$0xff]  ;;  %v25_v11 = vld [vmem:[%s311_s1 + $0x30] sm:$0xff] }
   0x5   :  { %137 = vmatpush.msra.mxu3 %v33_v3  ;;  %90 = vmatpush.msra.mxu1 %v26_v7  ;;  %v17_v12 = vld [vmem:[%s310_s0 + $0x10] sm:$0xff]  ;;  %v18_v13 = vld [vmem:[%s310_s0 + $0x18] sm:$0xff]  ;;  %v20_v14 = vld [vmem:[%s311_s1 + $0x8] sm:$0xff] }
   0x6   :  { %115 = vmatpush.msra.mxu2 %v28_v4  ;;  %68 = vmatpush.msra.mxu0 %v21_v10  ;;  %v24_v15 = vld [vmem:[%s311_s1 + $0x28] sm:$0xff]  ;;  %v19_v16 = vld [vmem:[%s311_s1] sm:$0xff] }
   0x7   :  { %138 = vmatpush.msra.mxu3 %v32_v5  ;;  %91 = vmatpush.msra.mxu1 %v25_v11  ;;  %v23_v17 = vld [vmem:[%s311_s1 + $0x20] sm:$0xff] }
   0x8   :  { %116 = vmatpush.msra.mxu2 %v27_v8 }
   0x9   :  { %139 = vmatpush.msra.mxu3 %v31_v9  ;;  %169 = vmatmul.msk.f32.vlgmr.msra.gmra.mxu2 %vm51_vm0, %v17_v12 }
   0xa   :  { %170 = vmatmul.msk.f32.vlgmr.msra.gmra.mxu3 %vm51_vm0, %v18_v13 }
   0xb   :  { %8 = vsyncpa [#allocation3], 0  ;;  %69 = vmatpush.msra.mxu0 %v20_v14  ;;  %92 = vmatpush.msra.mxu1 %v24_v15  ;;  %v15_v18 = vld [vmem:[%s310_s0] sm:$0xff]  ;;  %v16_v19 = vld [vmem:[%s310_s0 + $0x8] sm:$0xff]  ;;  %vm144_vm1 = vcmask 130048   ;;  %s204_s4 = smov [#allocation2]  }
   0xc   :  { %v174_v20 = vld [vmem:[%s312_s2] ss:$0 sm:$0xff]  ;;  %v175_v21 = vld [vmem:[%s312_s2 + $0x1] ss:$0 sm:$0xff]  ;;  %v176_v22 = vld [vmem:[%s312_s2 + $0x2] ss:$0 sm:$0xff] }
   0xd   :  { %70 = vmatpush.msra.mxu0 %v19_v16  ;;  %93 = vmatpush.msra.mxu1 %v23_v17  ;;  %v177_v23 = vld [vmem:[%s312_s2 + $0x3] ss:$0 sm:$0xff]  ;;  %s153_s5 = sshll.u32 %s204_s4, 4  ;;  %s155_s8 = sshll.u32 %s313_s3, 4  ;;  %s154_s5 = int_to_ptr.vmem [resolvable:$true] %s153_s5  ;;  %s156_s8 = int_to_ptr.hbm [resolvable:$true] %s155_s8 }
   0xe   :  { %167 = vmatmul.msk.f32.vlgmr.msra.gmra.mxu0 %vm51_vm0, %v15_v18  ;;  %168 = vmatmul.msk.f32.vlgmr.msra.gmra.mxu1 %vm51_vm0, %v16_v19  ;;  %s205_s2 = smov 128   ;;  %s206_s9 = smov 8  }
  0x8b   :  { %v72_v24 = vpop.f32.mrf.mxu0  ;;  %v95_v25 = vpop.f32.mrf.mxu1 }
  0x8c   :  { %v73_v26 = vadd.f32 %v174_v20, %v72_v24  ;;  %v96_v27 = vadd.f32 %v175_v21, %v95_v25  ;;  %v118_v28 = vpop.f32.mrf.mxu2 }
  0x8d   :  { %v141_v29 = vpop.f32.mrf.mxu3  ;;  %v119_v30 = vadd.f32 %v176_v22, %v118_v28 }
  0x8e   :  { %145 = vst.msk [vmem:[#allocation2] sm:$0xff] %vm144_vm1, %v73_v26  ;;  %v142_v31 = vadd.f32 %v177_v23, %v141_v29 }
  0x8f   :  { %146 = vst.msk [vmem:[#allocation2 + $0x8] sm:$0xff] %vm144_vm1, %v96_v27 }
  0x90   :  { %147 = vst.msk [vmem:[#allocation2 + $0x10] sm:$0xff] %vm144_vm1, %v119_v30 }
  0x91   :  { %148 = vst.msk [vmem:[#allocation2 + $0x18] sm:$0xff] %vm144_vm1, %v142_v31 }
  0x92   :  { %161 = dma.vmem_to_hbm [thread:$0]  %s154_s5, 512, %s156_s8, [#allocation3], %s205_s2, %s205_s2, %s206_s9  }
  0x93   :  { %202 = dma.done.wait [#allocation3], 512  }
  0x94   :  { %203 = vsyncadd [#allocation3], 4294966784 }
  0x95   :  { %166 = vsyncpa [#allocation3], 1 }

</bundles_post_ra>
